<compile_context>
chip_gen: v7x
topology: tpu7x:2x2x1
jax: 0.10.0
libtpu: 0.0.40
codegen_flags: <defaults>
</compile_context>

<pallas_src>
import functools

import jax
import jax.numpy as jnp
from jax.experimental import pallas as pl
from jax.experimental.pallas import tpu as pltpu


def _subscheduler_kernel(x_ref, w0a_ref, w0b_ref, b0_ref, w1d_ref, b1d_ref,
                         g_ref, adj_ref, *, directed):
    """Fused separable-MLP + symmetrization + hard Gumbel edge pick (one graph).

    x_ref   : (1, n, hid)    agent encodings for this graph
    w0a_ref : (hid, H)       first Linear weight acting on x_i
    w0b_ref : (hid, H)       first Linear weight acting on x_j
    b0_ref  : (1, H)         first Linear bias
    w1d_ref : (1, H)         w1[:, 1] - w1[:, 0]   (second Linear collapsed)
    b1d_ref : (1, 1)         b1[1] - b1[0]
    g_ref   : (1, 2, n, n)   Gumbel(0,1) noise, one plane per class
    adj_ref : (1, n, n)      output adjacency of 0./1.
    """
    x = x_ref[0]                                                     # (n, hid)

    # Two MXU dots (lane-aligned; no post-dot lane slicing):
    #   Linear([x_i, x_j]) = x_i @ W0a + x_j @ W0b + b0
    a = jnp.dot(x, w0a_ref[...], preferred_element_type=jnp.float32) + b0_ref[...]
    b = jnp.dot(x, w0b_ref[...], preferred_element_type=jnp.float32)   # (n, H)

    # Directed margin, reduced against w1d BEFORE any symmetrization:
    #   M[i, j] = relu(A[i] + B[j]) . w1d      (single (n, n, H) intermediate)
    h = jnp.maximum(a[:, None, :] + b[None, :, :], 0.0)              # (n, n, H)
    m = jnp.sum(h * w1d_ref[...], axis=-1)                           # (n, n)

    if not directed:
        # 0.5 * mlp([x_i, x_j]) + 0.5 * mlp([x_j, x_i]); the second layer is
        # linear, so averaging the per-direction margins is exact.  The
        # transpose is one cheap XLU op instead of a second (n,n,H) relu pass.
        m = 0.5 * (m + m.T)

    # F.gumbel_softmax(hard=True, tau=1) -> one_hot(argmax(logits + g));
    # torch.narrow(., 2, 1, 1) keeps the class-1 column, i.e. 1.0 iff
    #   logit1 + g1 > logit0 + g0  <=>  m + (g1 - g0) + (b1[1]-b1[0]) > 0.
    # (strict '>' matches torch.argmax's first-max tie convention: ties -> 0)
    thresh = (g_ref[0, 1] - g_ref[0, 0]) + b1d_ref[...]              # (n, n)
    adj_ref[0] = (m + thresh > 0.0).astype(jnp.float32)


def init_mlp_params(key, in_dim, hidden_dim, out_dim):
    """Deterministic synthetic MLP params: Linear(in->hidden), Linear(hidden->out).

    Weights stored (in_features, out_features) so the math is X @ W + b
    (identical to PyTorch's X @ W.T with its (out, in) storage).
    """
    k0, k1, k2, k3 = jax.random.split(key, 4)
    w0 = jax.random.normal(k0, (in_dim, hidden_dim), jnp.float32) / jnp.sqrt(in_dim)
    b0 = jax.random.normal(k1, (1, hidden_dim), jnp.float32) * 0.01
    w1 = jax.random.normal(k2, (hidden_dim, out_dim), jnp.float32) / jnp.sqrt(hidden_dim)
    b1 = jax.random.normal(k3, (1, out_dim), jnp.float32) * 0.01
    return w0, b0, w1, b1


def pack_params(params, hid):
    """One-time repack of the MLP params for the kernel (hoisted off the
    per-forward path — these are tiny XLA ops that would otherwise dominate
    the launch-bound forward)."""
    w0, b0, w1, b1 = params                  # w0:(2*hid,H) b0:(1,H) w1:(H,2) b1:(1,2)
    hidden = w0.shape[1]
    w0a = w0[:hid]                           # (hid, H)  acts on x_i
    w0b = w0[hid:]                           # (hid, H)  acts on x_j
    w1d = (w1[:, 1] - w1[:, 0]).reshape(1, hidden)       # (1, H)
    b1d = (b1[0, 1] - b1[0, 0]).reshape(1, 1)            # (1, 1)
    return w0a, w0b, b0, w1d, b1d


def sub_scheduler_forward(x, packed, gumbel, *, directed=False, learn_graph=True):
    """Batched SubScheduler.forward (forward value only).

    x      : (B, n, hid)       per-graph agent encodings
    packed : pack_params() output
    gumbel : (B, 2, n, n)      Gumbel(0,1) noise, one plane per class
    returns: (B, n, n)         hard adjacency of 0./1.
    """
    B, n, hid = x.shape

    if not learn_graph:
        return jnp.ones((B, n, n), jnp.float32)  # get_complete_graph() per graph

    w0a, w0b, b0, w1d, b1d = packed
    hidden = w0a.shape[1]

    kernel = functools.partial(_subscheduler_kernel, directed=directed)

    adj = pl.pallas_call(
        kernel,
        out_shape=jax.ShapeDtypeStruct((B, n, n), jnp.float32),
        grid=(B,),
        in_specs=[
            pl.BlockSpec((1, n, hid), lambda bi: (bi, 0, 0)),        # x
            pl.BlockSpec((hid, hidden), lambda bi: (0, 0)),          # w0a
            pl.BlockSpec((hid, hidden), lambda bi: (0, 0)),          # w0b
            pl.BlockSpec((1, hidden), lambda bi: (0, 0)),            # b0
            pl.BlockSpec((1, hidden), lambda bi: (0, 0)),            # w1d
            pl.BlockSpec((1, 1), lambda bi: (0, 0)),                 # b1d
            pl.BlockSpec((1, 2, n, n), lambda bi: (bi, 0, 0, 0)),    # gumbel planes
        ],
        out_specs=pl.BlockSpec((1, n, n), lambda bi: (bi, 0, 0)),
        compiler_params=pltpu.CompilerParams(
            dimension_semantics=("parallel",)),
    )(x, w0a, w0b, b0, w1d, b1d, gumbel)

    return adj


def _reference_margin(x, params, gumbel, *, directed):
    """Pure-JAX reference of (logit1 - logit0 + g1 - g0) per edge, original math.

    x: (n, hid), gumbel: (2, n, n) — class c noise for edge (i, j) is gumbel[c, i, j].
    """
    n, hid = x.shape
    w0, b0, w1, b1 = params
    left = jnp.broadcast_to(x[:, None, :], (n, n, hid)).reshape(n * n, hid)   # x_i
    right = jnp.broadcast_to(x[None, :, :], (n, n, hid)).reshape(n * n, hid)  # x_j

    def mlp(p):
        h = jnp.maximum(p @ w0 + b0, 0.0)
        return h @ w1 + b1

    logits = mlp(jnp.concatenate([left, right], axis=-1))
    if not directed:
        logits = 0.5 * logits + 0.5 * mlp(jnp.concatenate([right, left], axis=-1))
    y = logits + gumbel.reshape(2, n * n).T
    return (y[:, 1] - y[:, 0]).reshape(n, n)


if __name__ == "__main__":
    batch = 3             # graphs / environments per call (amortizes launch cost)
    n_agents = 8          # num_agents
    input_dim = 32        # per-agent encoding width (hid_size)
    mlp_hidden = 32       # mlp_config.mlp_hidden_dims = [32]
    out_classes = 2       # mlp_config.output_dim = 2 (off/on edge logits)

    key = jax.random.PRNGKey(0)
    kx, kp, kg = jax.random.split(key, 3)

    x = jax.random.normal(kx, (batch, n_agents, input_dim), jnp.float32)
    params = init_mlp_params(kp, 2 * input_dim, mlp_hidden, out_classes)
    packed = pack_params(params, input_dim)   # one-time, off the per-call path
    # Gumbel(0,1) noise for F.gumbel_softmax, sampled deterministically outside
    # the kernel; laid out as one (n, n) plane per class so the class difference
    # is computed inside the kernel.
    gumbel = jax.random.gumbel(
        kg, (batch, out_classes, n_agents, n_agents), jnp.float32)

    adj = sub_scheduler_forward(x, packed, gumbel, directed=False, learn_graph=True)
    adj = jax.block_until_ready(adj)

    assert adj.shape == (batch, n_agents, n_agents)
    assert bool(jnp.all((adj == 0.0) | (adj == 1.0)))

    # Cross-check the separable-weight / reduce-before-symmetrize rewrite
    # against the original formulation (ignore edges whose decision margin is
    # within float rounding of zero).
    for b in range(batch):
        margin = _reference_margin(x[b], params, gumbel[b], directed=False)
        expected = (margin > 0.0).astype(jnp.float32)
        decisive = jnp.abs(margin) > 1e-4
        assert bool(jnp.all(jnp.where(decisive, adj[b] == expected, True)))

    print("KERNEL_OK")
</pallas_src>

<mosaic_0001>
module attributes {stable_mosaic.version = 11 : i64} {
  func.func @_subscheduler_kernel(%arg0: i32, %arg1: memref<1x8x32xf32, #tpu.memory_space<vmem>>, %arg2: memref<32x32xf32, #tpu.memory_space<vmem>>, %arg3: memref<32x32xf32, #tpu.memory_space<vmem>>, %arg4: memref<1x32xf32, #tpu.memory_space<vmem>>, %arg5: memref<1x32xf32, #tpu.memory_space<vmem>>, %arg6: memref<1x1xf32, #tpu.memory_space<vmem>>, %arg7: memref<1x2x8x8xf32, #tpu.memory_space<vmem>>, %arg8: memref<1x8x8xf32, #tpu.memory_space<vmem>>) attributes {dimension_semantics = [#tpu.dimension_semantics<parallel>], iteration_bounds = array<i64: 3>, scalar_prefetch = 0 : i64, scratch_operands = 0 : i64, tpu.core_type = #tpu.core_type<tc>, window_params = [{transform_indices = @transform_0, window_bounds = array<i64: 1, 8, 32>}, {pipeline_mode = #tpu.pipeline_mode<synchronous>, transform_indices = @transform_1, window_bounds = array<i64: 32, 32>}, {pipeline_mode = #tpu.pipeline_mode<synchronous>, transform_indices = @transform_2, window_bounds = array<i64: 32, 32>}, {pipeline_mode = #tpu.pipeline_mode<synchronous>, transform_indices = @transform_3, window_bounds = array<i64: 1, 32>}, {pipeline_mode = #tpu.pipeline_mode<synchronous>, transform_indices = @transform_4, window_bounds = array<i64: 1, 32>}, {pipeline_mode = #tpu.pipeline_mode<synchronous>, transform_indices = @transform_5, window_bounds = array<i64: 1, 1>}, {transform_indices = @transform_6, window_bounds = array<i64: 1, 2, 8, 8>}, {transform_indices = @transform_7, window_bounds = array<i64: 1, 8, 8>}]} {
    %c0 = arith.constant 0 : index
    %c0_0 = arith.constant 0 : index
    %c0_1 = arith.constant 0 : index
    %0 = vector.load %arg1[%c0, %c0_0, %c0_1] : memref<1x8x32xf32, #tpu.memory_space<vmem>>, vector<1x8x32xf32>
    %1 = vector.shape_cast %0 : vector<1x8x32xf32> to vector<8x32xf32>
    %c0_2 = arith.constant 0 : index
    %c0_3 = arith.constant 0 : index
    %2 = vector.load %arg2[%c0_2, %c0_3] : memref<32x32xf32, #tpu.memory_space<vmem>>, vector<32x32xf32>
    %cst = arith.constant dense<0.000000e+00> : vector<8x32xf32>
    %3 = tpu.matmul %1, %2, %cst {dimension_numbers = #tpu.dot_dimension_numbers<[1], [0], [0], [1], [0, 0, 1, 1], [], []>} : vector<8x32xf32>, vector<32x32xf32>, vector<8x32xf32> -> vector<8x32xf32>
    %c0_4 = arith.constant 0 : index
    %c0_5 = arith.constant 0 : index
    %4 = vector.load %arg4[%c0_4, %c0_5] : memref<1x32xf32, #tpu.memory_space<vmem>>, vector<1x32xf32>
    %5 = vector.broadcast %4 : vector<1x32xf32> to vector<8x32xf32>
    %6 = arith.addf %3, %5 : vector<8x32xf32>
    %c0_6 = arith.constant 0 : index
    %c0_7 = arith.constant 0 : index
    %7 = vector.load %arg3[%c0_6, %c0_7] : memref<32x32xf32, #tpu.memory_space<vmem>>, vector<32x32xf32>
    %cst_8 = arith.constant dense<0.000000e+00> : vector<8x32xf32>
    %8 = tpu.matmul %1, %7, %cst_8 {dimension_numbers = #tpu.dot_dimension_numbers<[1], [0], [0], [1], [0, 0, 1, 1], [], []>} : vector<8x32xf32>, vector<32x32xf32>, vector<8x32xf32> -> vector<8x32xf32>
    %9 = vector.shape_cast %6 : vector<8x32xf32> to vector<8x1x32xf32>
    %10 = vector.shape_cast %8 : vector<8x32xf32> to vector<1x8x32xf32>
    %11 = vector.broadcast %9 : vector<8x1x32xf32> to vector<8x8x32xf32>
    %12 = vector.broadcast %10 : vector<1x8x32xf32> to vector<8x8x32xf32>
    %13 = arith.addf %11, %12 : vector<8x8x32xf32>
    %cst_9 = arith.constant 0.000000e+00 : f32
    %14 = vector.broadcast %cst_9 : f32 to vector<8x8x32xf32>
    %15 = arith.maximumf %13, %14 : vector<8x8x32xf32>
    %c0_10 = arith.constant 0 : index
    %c0_11 = arith.constant 0 : index
    %16 = vector.load %arg5[%c0_10, %c0_11] : memref<1x32xf32, #tpu.memory_space<vmem>>, vector<1x32xf32>
    %17 = vector.shape_cast %16 : vector<1x32xf32> to vector<1x1x32xf32>
    %18 = vector.broadcast %17 : vector<1x1x32xf32> to vector<8x8x32xf32>
    %19 = arith.mulf %15, %18 : vector<8x8x32xf32>
    %cst_12 = arith.constant dense<0.000000e+00> : vector<8x8xf32>
    %20 = vector.multi_reduction <add>, %19, %cst_12 [2] : vector<8x8x32xf32> to vector<8x8xf32>
    %21 = tpu.transpose %20, [1, 0] : vector<8x8xf32> -> vector<8x8xf32>
    %22 = arith.addf %20, %21 : vector<8x8xf32>
    %cst_13 = arith.constant 5.000000e-01 : f32
    %23 = vector.broadcast %cst_13 : f32 to vector<8x8xf32>
    %24 = arith.mulf %23, %22 : vector<8x8xf32>
    %c0_14 = arith.constant 0 : index
    %c1 = arith.constant 1 : index
    %c0_15 = arith.constant 0 : index
    %c0_16 = arith.constant 0 : index
    %25 = vector.load %arg7[%c0_14, %c1, %c0_15, %c0_16] : memref<1x2x8x8xf32, #tpu.memory_space<vmem>>, vector<1x1x8x8xf32>
    %26 = vector.shape_cast %25 : vector<1x1x8x8xf32> to vector<8x8xf32>
    %c0_17 = arith.constant 0 : index
    %c0_18 = arith.constant 0 : index
    %c0_19 = arith.constant 0 : index
    %c0_20 = arith.constant 0 : index
    %27 = vector.load %arg7[%c0_17, %c0_18, %c0_19, %c0_20] : memref<1x2x8x8xf32, #tpu.memory_space<vmem>>, vector<1x1x8x8xf32>
    %28 = vector.shape_cast %27 : vector<1x1x8x8xf32> to vector<8x8xf32>
    %29 = arith.subf %26, %28 : vector<8x8xf32>
    %c0_21 = arith.constant 0 : index
    %c0_22 = arith.constant 0 : index
    %30 = vector.load %arg6[%c0_21, %c0_22] : memref<1x1xf32, #tpu.memory_space<vmem>>, vector<1x1xf32>
    %31 = vector.broadcast %30 : vector<1x1xf32> to vector<8x8xf32>
    %32 = arith.addf %29, %31 : vector<8x8xf32>
    %33 = arith.addf %24, %32 : vector<8x8xf32>
    %cst_23 = arith.constant 0.000000e+00 : f32
    %34 = vector.broadcast %cst_23 : f32 to vector<8x8xf32>
    %35 = arith.cmpf ogt, %33, %34 : vector<8x8xf32>
    %36 = arith.extui %35 : vector<8x8xi1> to vector<8x8xi32>
    %37 = arith.sitofp %36 : vector<8x8xi32> to vector<8x8xf32>
    %c0_24 = arith.constant 0 : index
    %c0_25 = arith.constant 0 : index
    %c0_26 = arith.constant 0 : index
    %38 = vector.load %arg8[%c0_24, %c0_25, %c0_26] : memref<1x8x8xf32, #tpu.memory_space<vmem>>, vector<1x8x8xf32>
    %39 = vector.shape_cast %38 : vector<1x8x8xf32> to vector<8x8xf32>
    %40 = vector.shape_cast %37 : vector<8x8xf32> to vector<1x8x8xf32>
    tpu.vector_store %arg8[%c0_24, %c0_25, %c0_26], %40 {strides = array<i32>} : memref<1x8x8xf32, #tpu.memory_space<vmem>>, vector<1x8x8xf32>,
    return
  }
  func.func @transform_0(%arg0: i32) -> (i32, i32, i32) {
    %c0_i32 = arith.constant 0 : i32
    %c0_i32_0 = arith.constant 0 : i32
    %c0_i32_1 = arith.constant 0 : i32
    return %arg0, %c0_i32, %c0_i32_0 : i32, i32, i32
  }
  func.func @transform_1(%arg0: i32) -> (i32, i32) {
    %c0_i32 = arith.constant 0 : i32
    %c0_i32_0 = arith.constant 0 : i32
    %c0_i32_1 = arith.constant 0 : i32
    return %c0_i32, %c0_i32_0 : i32, i32
  }
  func.func @transform_2(%arg0: i32) -> (i32, i32) {
    %c0_i32 = arith.constant 0 : i32
    %c0_i32_0 = arith.constant 0 : i32
    %c0_i32_1 = arith.constant 0 : i32
    return %c0_i32, %c0_i32_0 : i32, i32
  }
  func.func @transform_3(%arg0: i32) -> (i32, i32) {
    %c0_i32 = arith.constant 0 : i32
    %c0_i32_0 = arith.constant 0 : i32
    %c0_i32_1 = arith.constant 0 : i32
    return %c0_i32, %c0_i32_0 : i32, i32
  }
  func.func @transform_4(%arg0: i32) -> (i32, i32) {
    %c0_i32 = arith.constant 0 : i32
    %c0_i32_0 = arith.constant 0 : i32
    %c0_i32_1 = arith.constant 0 : i32
    return %c0_i32, %c0_i32_0 : i32, i32
  }
  func.func @transform_5(%arg0: i32) -> (i32, i32) {
    %c0_i32 = arith.constant 0 : i32
    %c0_i32_0 = arith.constant 0 : i32
    %c0_i32_1 = arith.constant 0 : i32
    return %c0_i32, %c0_i32_0 : i32, i32
  }
  func.func @transform_6(%arg0: i32) -> (i32, i32, i32, i32) {
    %c0_i32 = arith.constant 0 : i32
    %c0_i32_0 = arith.constant 0 : i32
    %c0_i32_1 = arith.constant 0 : i32
    %c0_i32_2 = arith.constant 0 : i32
    return %arg0, %c0_i32, %c0_i32_0, %c0_i32_1 : i32, i32, i32, i32
  }
  func.func @transform_7(%arg0: i32) -> (i32, i32, i32) {
    %c0_i32 = arith.constant 0 : i32
    %c0_i32_0 = arith.constant 0 : i32
    %c0_i32_1 = arith.constant 0 : i32
    return %arg0, %c0_i32, %c0_i32_0 : i32, i32, i32
  }
}

</mosaic_0001>

<bundles_post_ra>
// kernel: tpu_custom_call.1
= control target key start
LH: loop header
LB: loop body
LE: loop exit
PB: predicated region body
PF: predicated region fallthrough
CT: control target
= control target key end

     0   :  { %s1984_s0 = inlined_call_operand.hbm [shape: f32[3,8,32], index: 0, kind: input, shape index: {}]   ;;  %s1985_s1 = inlined_call_operand.hbm [shape: f32[32,32], index: 1, kind: input, shape index: {}]   ;;  %s1986_s2 = inlined_call_operand.hbm [shape: f32[32,32], index: 2, kind: input, shape index: {}]   ;;  %s1987_s3 = inlined_call_operand.vmem [shape: f32[1,32], index: 3, kind: input, shape index: {}]   ;;  %s1988_s4 = inlined_call_operand.vmem [shape: f32[1,32], index: 4, kind: input, shape index: {}]   ;;  %s1989_s5 = inlined_call_operand.<no memory space> [shape: f32[1,1], index: 5, kind: input, shape index: {}]   ;;  %s1990_s6 = inlined_call_operand.hbm [shape: f32[3,2,8,8], index: 6, kind: input, shape index: {}]   ;;  %s1991_s7 = inlined_call_operand.hbm [shape: f32[3,8,8], index: 7, kind: output, shape index: {}]  }
   0x1   :  { %1997 = sst [smem:[#allocation16_spill]] %s1984_s0  ;;  %v12_v0 = vstv %s1989_s5 }
   0x2   :  { %13 = vst [vmem:[#allocation2] sm:$0x1] %v12_v0 }
   0x3   :  { %14 = vsyncpa [#allocation4], 0 }
   0x4   :  { %16 = vsyncpa [#allocation4 + $0x1], 0 }
   0x5   :  { %17 = vsyncpa [#allocation7], 0 }
   0x6   :  { %18 = vsyncpa [#allocation10], 0 }
   0x7   :  { %20 = vsyncpa [#allocation10 + $0x1], 0 }
   0x8   :  { %21 = vsyncpa [#allocation5], 0 }
   0x9   :  { %23 = vsyncpa [#allocation5 + $0x1], 0  ;;  %s1579_s26 = smov 0   ;;  %s1581_s27 = smov 0  }
   0xa   :  { %s1583_s28 = smov 0   ;;  %s1585_s29 = smov 0  }
   0xb LB: > { %s1600_s5 = sadd.s32 4294967295, %s1522_s29   ;;  %s1152_s30 = sadd.s32 4294967294, %s1522_s29   ;;  %s1522_s29 = sphi %s1585_s29, %s2016_s29   ;;  %s1518_s28 = sphi %s1583_s28, %s2015_s28   ;;  %s1514_s27 = sphi %s1581_s27, %s2014_s27   ;;  %s1510_s26 = sphi %s1579_s26, %s2013_s26  }
   0xc   : > { %p49_p0 = scmp.ne.s32.totalorder %s1514_s27, %s1510_s26  ;;  %p1992_p1 = scmp.eq.s32.totalorder %s1600_s5, 0 }
   0xd   : > { %p210_p3 = scmp.eq.s32.totalorder %s1152_s30, 2  ;;  %p1153_p5 = scmp.ge.s32.totalorder %s1522_s29, 1 }
   0xe   : > { %p1609_p4 = por %p1992_p1, %p49_p0  ;;  %p217_p7 = scmp.lt.s32.totalorder %s1522_s29, 4 }
   0xf   : > { %p1614_p6 = por %p210_p3, %p49_p0  ;;  %s1524_s11 = smov [#allocation6]  }
  0x10   : > { %s1998_s8 = scalar_select %p1609_p4, 1, 0 }
  0x11   : > { %s1999_s9 = scalar_select %p1614_p6, 1, 0 }
  0x12   : > { %p1619_p8 = pnand %p1153_p5, %p217_p7  ;;  %s229_s12 = sshll.u32 %s1524_s11, 4  ;;  %s230_s12 = int_to_ptr.vmem [resolvable:$true] %s229_s12 }
  0x13   : > { %s1525_s14 = smov [#allocation8]   ;;  %s1332_s18 = scalar_lea.hbm %s1985_s1, 512 }
  0x14   : > { %s2000_s10 = scalar_select %p1619_p8, 1, 0 }
  0x15   : > { %p1245_p9 = pneg %p1619_p8  ;;  %s242_s15 = sshll.u32 %s1525_s14, 4  ;;  %s1631_s15 = int_to_ptr.vmem [resolvable:$true] %s242_s15 }
  0x16   : > { %p1333_p11 = scmp.ne.s32.totalorder %s1985_s1, %s1332_s18  ;;  %p1339_p3 = scmp.lt.u32.totalorder %s1332_s18, %s1985_s1 }
  0x17   : > { %p1627_p10 = pnand %p1245_p9, %p1992_p1 }
  0x19   : > { %p1334_p12 = pneg %p1627_p10 }
  0x1b   : > { %p1335_p13 = pnand %p1334_p12, %p1333_p11 }
  0x1d   : > { %p1336_p0 = pneg %p1335_p13 }
  0x1f   : > { %p1341_p5 = pnand %p1339_p3, %p1336_p0 }
  0x21   : > { %1344 = shalt.err (!%p1341_p5)
}
  0x22   : > { %s1345_s23 = scalar_lea.vmem %s230_s12, 512  ;;  %p1353_p2 = scmp.lt.s32.totalorder %s230_s12, %s230_s12 }
  0x23   : > { %p1346_p7 = scmp.ne.s32.totalorder %s230_s12, %s1345_s23  ;;  %p1354_p6 = scmp.lt.s32.totalorder %s1345_s23, %s1345_s23 }
  0x25   : > { %p1348_p9 = pnand %p1346_p7, %p1334_p12  ;;  %p1355_p4 = por %p1354_p6, %p1353_p2 }
  0x27   : > { %p1349_p1 = pneg %p1348_p9 }
  0x29   : > { %p1356_p8 = pnand %p1355_p4, %p1349_p1 }
  0x2b   : > { %1359 = shalt.err (!%p1356_p8)
}
  0x2c   : > { %s1995_s24 = smov 128   ;;  %s1996_s25 = smov 8  }
  0x2d   : > { %1248 = dma.hbm_to_vmem [thread:$0]  (!%p1627_p10), %s1985_s1, 512, %s230_s12, [#allocation7], %s1995_s24, %s1995_s24, %s1996_s25  }
  0x2e   : > { %s1360_s17 = scalar_lea.hbm %s1986_s2, 512 }
  0x2f   : > { %p1361_p1 = scmp.ne.s32.totalorder %s1986_s2, %s1360_s17  ;;  %p1367_p6 = scmp.lt.u32.totalorder %s1360_s17, %s1986_s2 }
  0x31   : > { %p1363_p2 = pnand %p1361_p1, %p1334_p12 }
  0x33   : > { %p1364_p4 = pneg %p1363_p2 }
  0x35   : > { %p1369_p8 = pnand %p1367_p6, %p1364_p4 }
  0x37   : > { %1372 = shalt.err (!%p1369_p8)
}
  0x38   : > { %s1373_s12 = scalar_lea.vmem %s1631_s15, 512  ;;  %p1381_p3 = scmp.lt.s32.totalorder %s1631_s15, %s1631_s15 }
  0x39   : > { %p1374_p11 = scmp.ne.s32.totalorder %s1631_s15, %s1373_s12  ;;  %p1382_p5 = scmp.lt.s32.totalorder %s1373_s12, %s1373_s12 }
  0x3b   : > { %p1376_p13 = pnand %p1374_p11, %p1334_p12  ;;  %p1383_p7 = por %p1382_p5, %p1381_p3 }
  0x3d   : > { %p1377_p0 = pneg %p1376_p13 }
  0x3f   : > { %p1384_p9 = pnand %p1383_p7, %p1377_p0 }
  0x41   : > { %1387 = shalt.err (!%p1384_p9)
}
  0x42   : > { %1251 = dma.hbm_to_vmem [thread:$0]  (!%p1627_p10), %s1986_s2, 512, %s1631_s15, [#allocation7], %s1995_s24, %s1995_s24, %s1996_s25  }
  0x43   : > { %s1687_s13 = sadd.s32 1, %s1522_s29   ;;  %s36_s30 = sadd.s32 1, %s1518_s28 }
  0x44   : > { %s33_s11 = ssub.s32 %s1522_s29, %s1687_s13  ;;  %p43_p12 = scmp.ne.s32.totalorder %s1518_s28, %s1514_s27 }
  0x45   : > { %p34_p1 = scmp.eq.s32.totalorder %s33_s11, 0  ;;  %p44_p2 = scmp.eq.s32.totalorder %s1522_s29, 0 }
  0x46   : > { %p2002_p4 = scmp.eq.s32.totalorder %s1600_s5, 2  ;;  %p1265_p8 = scmp.lt.s32.totalorder %s1522_s29, 3 }
  0x47   : > { %s1703_s16 = scalar_select %p34_p1, %s1518_s28, %s36_s30  }
  0x48   : > { %p1697_p6 = por %p2002_p4, %p43_p12  ;;  %p45_p11 = por %p44_p2, %p43_p12 }
  0x49   : > { %s1706_s17 = sand.u32 1, %s1518_s28   ;;  %s1158_s18 = sshll.u32 %s1522_s29, 7 }
  0x4a   : > { %s1157_s15 = sshll.u32 %s1706_s17, 3  ;;  %s2004_s0 = sld [smem:[#allocation16_spill]] }
  0x4b   : > { %s269_s12 = scalar_lea.vmem [#allocation3], %s1157_s15  ;;  %p1717_p10 = pnand %p1265_p8, %p45_p11 }
  0x4c   : > { %s276_s22 = sshll.u32 %s269_s12, 4  ;;  %s1159_s30 = sshll.u32 %s1706_s17, 4  ;;  %s1715_s22 = int_to_ptr.vmem [resolvable:$true] %s276_s22 }
  0x4d   : > { %s266_s11 = scalar_lea.sflag [#allocation4], %s1706_s17  ;;  %p1390_p0 = pneg %p1717_p10 }
  0x50   : > { %s1713_s21 = scalar_lea.hbm %s2004_s0, %s1158_s18  ;;  %s1393_s19 = scalar_lea.hbm %s2004_s0, 384 }
  0x51   : > { %s1388_s24 = scalar_lea.hbm %s1713_s21, 128  ;;  %p1394_p7 = scmp.lt.u32.totalorder %s1713_s21, %s2004_s0 }
  0x52   : > { %p1389_p13 = scmp.ne.s32.totalorder %s1713_s21, %s1388_s24  ;;  %p1395_p9 = scmp.lt.u32.totalorder %s1393_s19, %s1388_s24 }
  0x53   : > { %p1397_p1 = scmp.lt.u32.totalorder %s1388_s24, %s1713_s21 }
  0x54   : > { %p1391_p3 = pnand %p1390_p0, %p1389_p13  ;;  %p1396_p12 = por %p1395_p9, %p1394_p7 }
  0x56   : > { %p1392_p5 = pneg %p1391_p3  ;;  %p1398_p2 = por %p1397_p1, %p1396_p12 }
  0x58   : > { %p1399_p4 = pnand %p1398_p2, %p1392_p5 }
  0x5a   : > { %1402 = shalt.err (!%p1399_p4)
}
  0x5b   : > { %s1403_s25 = scalar_lea.vmem %s1715_s22, 128  ;;  %s1528_s15 = smov [#allocation3]  }
  0x5c   : > { %p1404_p8 = scmp.ne.s32.totalorder %s1715_s22, %s1403_s25  ;;  %s1408_s18 = sshll.u32 %s1528_s15, 4  ;;  %s1409_s18 = int_to_ptr.vmem [resolvable:$false] %s1408_s18 }
  0x5d   : > { %s1410_s20 = scalar_lea.vmem %s1409_s18, 256  ;;  %p1411_p3 = scmp.lt.s32.totalorder %s1715_s22, %s1409_s18 }
  0x5e   : > { %p1406_p11 = pnand %p1404_p8, %p1390_p0  ;;  %p1412_p7 = scmp.lt.s32.totalorder %s1410_s20, %s1403_s25 }
  0x60   : > { %p1407_p13 = pneg %p1406_p11  ;;  %p1413_p9 = por %p1412_p7, %p1411_p3 }
  0x62   : > { %p1414_p12 = pnand %p1413_p9, %p1407_p13 }
  0x64   : > { %1417 = shalt.err (!%p1414_p12)
}
  0x65   : > { %1255 = dma.hbm_to_vmem [thread:$0]  (!%p1717_p10), %s1713_s21, 128, %s1715_s22, %s266_s11  }
  0x66   : > { %s1186_s24 = sshll.u32 %s1522_s29, 8  ;;  %s287_s19 = scalar_lea.vmem [#allocation9], %s1159_s30 }
  0x67   : > { %s294_s12 = sshll.u32 %s287_s19, 4  ;;  %s1754_s25 = scalar_lea.hbm %s1990_s6, %s1186_s24  ;;  %s1756_s12 = int_to_ptr.vmem [resolvable:$true] %s294_s12 }
  0x68   : > { %s284_s18 = scalar_lea.sflag [#allocation10], %s1706_s17  ;;  %s1418_s20 = scalar_lea.hbm %s1754_s25, 256 }
  0x69   : > { %p1419_p5 = scmp.ne.s32.totalorder %s1754_s25, %s1418_s20  ;;  %s1423_s30 = scalar_lea.hbm %s1990_s6, 768 }
  0x6a   : > { %p1424_p4 = scmp.lt.u32.totalorder %s1754_s25, %s1990_s6  ;;  %p1425_p8 = scmp.lt.u32.totalorder %s1423_s30, %s1418_s20 }
  0x6b   : > { %p1421_p1 = pnand %p1419_p5, %p1390_p0  ;;  %p1427_p13 = scmp.lt.u32.totalorder %s1418_s20, %s1754_s25 }
  0x6c   : > { %p1426_p11 = por %p1425_p8, %p1424_p4 }
  0x6d   : > { %p1422_p2 = pneg %p1421_p1 }
  0x6e   : > { %p1428_p3 = por %p1427_p13, %p1426_p11 }
  0x70   : > { %p1429_p7 = pnand %p1428_p3, %p1422_p2 }
  0x72   : > { %1432 = shalt.err (!%p1429_p7)
}
  0x73   : > { %s1433_s24 = scalar_lea.vmem %s1756_s12, 256  ;;  %s1529_s19 = smov [#allocation9]  }
  0x74   : > { %p1434_p9 = scmp.ne.s32.totalorder %s1756_s12, %s1433_s24  ;;  %s1438_s15 = sshll.u32 %s1529_s19, 4  ;;  %s1439_s15 = int_to_ptr.vmem [resolvable:$false] %s1438_s15 }
  0x75   : > { %s1440_s21 = scalar_lea.vmem %s1439_s15, 512  ;;  %p1441_p1 = scmp.lt.s32.totalorder %s1756_s12, %s1439_s15 }
  0x76   : > { %p1436_p12 = pnand %p1434_p9, %p1390_p0  ;;  %p1442_p4 = scmp.lt.s32.totalorder %s1440_s21, %s1433_s24 }
  0x78   : > { %p1437_p5 = pneg %p1436_p12  ;;  %p1443_p8 = por %p1442_p4, %p1441_p1 }
  0x7a   : > { %p1444_p11 = pnand %p1443_p8, %p1437_p5 }
  0x7c   : > { %1447 = shalt.err (!%p1444_p11)
}
  0x7d   : > { %s2006_s20 = smov 8   ;;  %s2007_s22 = smov 128  }
  0x7e   : > { %1258 = dma.hbm_to_vmem [thread:$0]  (!%p1717_p10), %s1754_s25, 256, %s1756_s12, %s284_s18, %s2007_s22, %s2007_s22, %s2006_s20  }
  0x7f   : > { %p2008_p0 = scmp.ne.s32.totalorder %s2000_s10, 0 }
  0x80   : > { %s1790_s30 = sand.u32 (!%p2008_p0), 1, %s1514_s27   ;;  %p2009_p2 = scmp.ne.s32.totalorder (!%p2008_p0), %s1998_s8, 0 }
  0x81   : > { %306 = sbr.rel (%p2008_p0) target bundleno = 971 (0x3cb), region = 48  ;;  %s1163_s0 = sshll.u32 (!%p2008_p0), %s1790_s30, 3 }
  0x82   : > { %s309_s23 = scalar_lea.sflag (!%p2008_p0), [#allocation4], %s1790_s30  ;;  %s1796_s11 = scalar_lea.vmem (!%p2008_p0), [#allocation3], %s1163_s0 }
  0x88   : > { %1493 = dma.done.wait (%p2009_p2), %s309_s23, 128  }
  0x89   : > { %1495 = vsyncadd (%p2009_p2), %s309_s23, 4294967168  ;;  %p2010_p10 = scmp.eq.s32.totalorder %s1600_s5, 0 }
  0x8b   : > { %1497 = dma.done.wait (%p2010_p10), [#allocation7], 1024   ;;  %p2011_p13 = pmov %p2010_p10 }
  0x8c   : > { %s1166_s10 = sshll.u32 %s1790_s30, 4  ;;  %s326_s17 = scalar_lea.sflag [#allocation10], %s1790_s30 }
  0x8d   : > { %1499 = vsyncadd (%p2011_p13), [#allocation7], 4294966272  ;;  %s1808_s12 = scalar_lea.vmem [#allocation9], %s1166_s10 }
  0x8e   : > { %1501 = dma.done.wait (%p2009_p2), %s326_s17, 256  }
  0x8f   : > { %1503 = vsyncadd (%p2009_p2), %s326_s17, 4294967040  ;;  %v1530_v1 = vmov 0.0|0.0   ;;  %vm1531_vm0 = vmmov 0   ;;  %v1532_v2 = vmov 0.0   ;;  %v366_v3 = vld [vmem:[#allocation6] sm:$0xff]  ;;  %v367_v4 = vld [vmem:[#allocation6 + $0x8] sm:$0xff]  ;;  %v530_v19 = vlaneseq }
  0x90   : > { %1219 = vmatprep.subr.bf16.mxu0 %v1530_v1  ;;  %1205 = vmatprep.mubr.msk.f32.mxu0 %vm1531_vm0, %v1532_v2  ;;  %v368_v5 = vld [vmem:[#allocation6 + $0x10] sm:$0xff]  ;;  %v1220_v6 = vpack.c.bf16 %v367_v4, %v366_v3  ;;  %v369_v7 = vld [vmem:[#allocation6 + $0x18] sm:$0xff]  ;;  %v451_v8 = vld [vmem:[#allocation8] sm:$0xff]  ;;  %vm377_vm1 = vcmask 261120   ;;  %v1533_v16 = vmov 0   ;;  %vm712_vm2 = vcmask 1041409  }
  0x91   : > { %1225 = vmatprep.subr.bf16.mxu1 %v1530_v1  ;;  %1216 = vmatprep.mubr.msk.f32.mxu1 %vm1531_vm0, %v1532_v2  ;;  %v452_v9 = vld [vmem:[#allocation8 + $0x8] sm:$0xff]  ;;  %v453_v10 = vld [vmem:[#allocation8 + $0x10] sm:$0xff]  ;;  %v454_v11 = vld [vmem:[#allocation8 + $0x18] sm:$0xff]  ;;  %v1223_v12 = vpack.c.bf16 %v369_v7, %v368_v5  ;;  %v1534_v17 = vmov 1966171168   ;;  %v1821_v21 = vshrl.u32 %v530_v19, 7 }
  0x92   : > { %1221 = vmatpush3.bf16.msra.mxu0 %v1220_v6  ;;  %v1226_v13 = vpack.c.bf16 %v452_v9, %v451_v8  ;;  %v1229_v14 = vpack.c.bf16 %v454_v11, %v453_v10  ;;  %v365_v15 = vld [vmem:[%s1796_s11] sm:$0xff]  ;;  %1310 = vset.pattern.permute.xlu0 %v1533_v16  ;;  %v528_v18 = vunpack.c.l.s4 %v1534_v17  ;;  %v1168_v22 = vld [vmem:[%s1987_s3] ss:$0 sm:$0xff]  ;;  %vm714_vm3 = vcmask 1042434   ;;  %s1183_s19 = sshll.u32 %s1600_s5, 7  ;;  %s364_s15 = scalar_lea.vmem [#allocation11], %s1163_s0 }
  0x93   : > { %1222 = vmatprep.subr.bf16.mxu0 %v1530_v1  ;;  %v1828_v31 = vsub.s32 0, %v1821_v21  ;;  %v1171_v47 = vld [vmem:[%s1988_s4] ss:$0 sm:$0xff]  ;;  %vm716_vm4 = vcmask 1043459   ;;  %vm718_vm5 = vcmask 1044484   ;;  %vm720_vm6 = vcmask 1045509   ;;  %s1940_s23 = scalar_lea.hbm %s1991_s7, %s1183_s19 }
  0x94   : > { %1227 = vmatpush3.bf16.msra.mxu1 %v1226_v13  ;;  %v529_v20 = vunpack.c.0.s8 %v528_v18  ;;  %vm722_vm7 = vcmask 1046534   ;;  %vm724_vm8 = vcmask 1047559   ;;  %s1040_s21 = sshll.u32 %s364_s15, 4  ;;  %s1027_s5 = scalar_lea.sflag [#allocation5], %s1790_s30  ;;  %s1942_s21 = int_to_ptr.vmem [resolvable:$true] %s1040_s21 }
  0x95   : > { %1228 = vmatprep.subr.bf16.mxu1 %v1530_v1  ;;  %s1448_s0 = scalar_lea.vmem %s1942_s21, 128  ;;  %s1535_s11 = smov [#allocation11]  }
  0x96   : > { %1224 = vmatpush3.bf16.msra.mxu0 %v1223_v12  ;;  %v532_v23 = vsub.s32 %v529_v20, %v1821_v21  ;;  %p1449_p3 = scmp.ne.s32.totalorder %s1942_s21, %s1448_s0  ;;  %s1452_s10 = sshll.u32 %s1535_s11, 4  ;;  %s1453_s10 = int_to_ptr.vmem [resolvable:$false] %s1452_s10 }
  0x97   : > { %s1454_s17 = scalar_lea.vmem %s1453_s10, 256  ;;  %p1455_p12 = scmp.lt.s32.totalorder %s1942_s21, %s1453_s10 }
  0x98   : > { %1230 = vmatpush3.bf16.msra.mxu1 %v1229_v14  ;;  %p1450_p7 = pnand %p1449_p3, %p1697_p6  ;;  %p1456_p5 = scmp.lt.s32.totalorder %s1454_s17, %s1448_s0 }
  0x99   : > { %1206 = vmatmul.mubr.msk.f32.vlgmr.msra.gmra.mrb[0].mxu0 %vm377_vm1, %v365_v15 }
  0x9a   : > { %p1451_p9 = pneg %p1450_p7  ;;  %p1457_p1 = por %p1456_p5, %p1455_p12 }
  0x9b   : > { %1217 = vmatmul.mubr.msk.f32.vlgmr.msra.gmra.mrb[0].mxu1 %vm377_vm1, %v365_v15 }
  0x9c   : > { %p1458_p4 = pnand %p1457_p1, %p1451_p9 }
 0x16c   : > { %v447_v24 = vpop.f32.mrb[0].mxu0 }
 0x16d   : > { %v448_v25 = vadd.f32 %v1168_v22, %v447_v24  ;;  %v1207_v26 = vpop.f32.mrb[1].mxu0  ;;  %v1173_v24 = vld [vmem:[#allocation2] ss:$0 sm:$0xff] }
 0x16e   : > { %v521_v27 = vpop.f32.mrb[0].mxu1 }
 0x16f   : > { %v526_v28 = vcombine.high %v448_v25, %v448_v25  ;;  %v533_v29 = vrot.slane %v448_v25, %v532_v23  ;;  %v1218_v30 = vpop.f32.mrb[1].mxu1  ;;  %v679_v25 = vand.u32 127, %v530_v19 }
 0x171   : > { %v540_v32 = vrot.slane %v526_v28, %v532_v23  ;;  %v541_v33 = vcombine.high %v533_v29, %v533_v29  ;;  %v549_v34 = vrot.slane %v533_v29, %v532_v23 }
 0x173   : > { %v542_v35 = vcombine.high %v540_v32, %v540_v32  ;;  %v556_v36 = vrot.slane %v540_v32, %v532_v23  ;;  %v563_v37 = vrot.slane %v541_v33, %v532_v23  ;;  %v571_v38 = vcombine.high %v549_v34, %v549_v34 }
 0x174   : > { %v578_v39 = vrot.slane %v549_v34, %v1828_v31 }
 0x175   : > { %v570_v40 = vrot.slane %v542_v35, %v532_v23  ;;  %v572_v41 = vcombine.high %v556_v36, %v556_v36  ;;  %v573_v42 = vcombine.high %v563_v37, %v563_v37  ;;  %v586_v43 = vrot.slane %v571_v38, %v1828_v31 }
 0x176   : > { %v615_v44 = vadd.f32 %v578_v39, %v521_v27  ;;  %v582_v45 = vrot.slane %v563_v37, %v1828_v31  ;;  %v594_v46 = vrot.slane %v556_v36, %v1828_v31 }
 0x177   : > { %v617_v48 = vadd.f32 %v586_v43, %v521_v27  ;;  %v590_v49 = vrot.slane %v573_v42, %v1828_v31  ;;  %v598_v50 = vrot.slane %v570_v40, %v1828_v31  ;;  %v602_v51 = vrot.slane %v572_v41, %v1828_v31 }
 0x178   : > { %v623_v52 = vmax.f32 %v615_v44, 0.0  ;;  %v616_v53 = vadd.f32 %v582_v45, %v521_v27  ;;  %v619_v54 = vadd.f32 %v594_v46, %v521_v27  ;;  %v574_v55 = vcombine.high %v570_v40, %v570_v40 }
 0x179   : > { %v625_v56 = vmax.f32 %v617_v48, 0.0  ;;  %v618_v57 = vadd.f32 %v590_v49, %v521_v27  ;;  %v620_v58 = vadd.f32 %v598_v50, %v521_v27  ;;  %v621_v59 = vadd.f32 %v602_v51, %v521_v27  ;;  %v1172_v48 = vld [vmem:[%s1808_s12 + $0x8] sm:$0xff]  ;;  %v842_v49 = vld [vmem:[%s1808_s12] sm:$0xff] }
 0x17a   : > { %v638_v60 = vmul.f32 %v1171_v47, %v623_v52  ;;  %v624_v61 = vmax.f32 %v616_v53, 0.0  ;;  %v606_v62 = vrot.slane %v574_v55, %v1828_v31  ;;  %v627_v4 = vmax.f32 %v619_v54, 0.0 }
 0x17b   : > { %v640_v63 = vmul.f32 %v1171_v47, %v625_v56  ;;  %v626_v0 = vmax.f32 %v618_v57, 0.0  ;;  %v628_v8 = vmax.f32 %v620_v58, 0.0  ;;  %v629_v11 = vmax.f32 %v621_v59, 0.0 }
 0x17c   : > { %v646_v1 = vsel %vm377_vm1, %v638_v60, 0.0  ;;  %v639_v3 = vmul.f32 %v1171_v47, %v624_v61  ;;  %v622_v5 = vadd.f32 %v606_v62, %v521_v27  ;;  %v642_v10 = vmul.f32 %v1171_v47, %v627_v4 }
 0x17d   : > { %647 = vadd.xlane.f32.xlu0 %v646_v1  ;;  %v652_v6 = vsel %vm377_vm1, %v640_v63, 0.0  ;;  %v641_v7 = vmul.f32 %v1171_v47, %v626_v0  ;;  %v643_v13 = vmul.f32 %v1171_v47, %v628_v8  ;;  %v644_v17 = vmul.f32 %v1171_v47, %v629_v11 }
 0x17e   : > { %653 = vadd.xlane.f32.xlu1 %v652_v6  ;;  %v649_v9 = vsel %vm377_vm1, %v639_v3, 0.0  ;;  %v630_v14 = vmax.f32 %v622_v5, 0.0  ;;  %v658_v15 = vsel %vm377_vm1, %v642_v10, 0.0  ;;  %v1853_v27 = vsub.s32 %v679_v25, %v1821_v21 }
 0x17f   : > { %v655_v12 = vsel %vm377_vm1, %v641_v7, 0.0  ;;  %v661_v18 = vsel %vm377_vm1, %v643_v13, 0.0  ;;  %v664_v22 = vsel %vm377_vm1, %v644_v17, 0.0  ;;  %v843_v52 = vsub.f32 %v1172_v48, %v842_v49 }
 0x180   : > { %v645_v20 = vmul.f32 %v1171_v47, %v630_v14  ;;  %v769_v55 = vsub.s32 1, %v1821_v21  ;;  %v776_v58 = vsub.s32 2, %v1821_v21  ;;  %v783_v63 = vsub.s32 3, %v1821_v21 }
 0x181   : > { %650 = vadd.xlane.f32.xlu0 %v649_v9  ;;  %v797_v3 = vsub.s32 5, %v1821_v21  ;;  %v790_v4 = vsub.s32 4, %v1821_v21  ;;  %v804_v10 = vsub.s32 6, %v1821_v21 }
 0x182   : > { %656 = vadd.xlane.f32.xlu1 %v655_v12  ;;  %v667_v23 = vsel %vm377_vm1, %v645_v20, 0.0  ;;  %vm1024_vm1 = vcmask 64512  }
 0x185   : > { %659 = vadd.xlane.f32.xlu0 %v658_v15 }
 0x186   : > { %662 = vadd.xlane.f32.xlu1 %v661_v18 }
 0x189   : > { %665 = vadd.xlane.f32.xlu0 %v664_v22 }
 0x18a   : > { %668 = vadd.xlane.f32.xlu1 %v667_v23 }
 0x19f   : > { %851 = vperm.xlu0 %1310, %v1173_v24  }
 0x20a   : > { %v1850_v26 = vpop.xlane.xlu0 %647 }
 0x20b   : > { %v1855_v28 = vpop.xlane.xlu1 %653  ;;  %v683_v30 = vrot.slane %v1850_v26, %v1853_v27 }
 0x20c   : > { %v691_v19 = vrot.slane %v1855_v28, %v1853_v27 }
 0x20e   : > { %v1857_v29 = vpop.xlane.xlu0 %650 }
 0x20f   : > { %v687_v32 = vrot.slane %v1857_v29, %v1853_v27  ;;  %v1863_v33 = vpop.xlane.xlu1 %656 }
 0x210   : > { %v695_v34 = vrot.slane %v1863_v33, %v1853_v27 }
 0x211   : > { %v713_v35 = vsel %vm712_vm2, %v687_v32, %v683_v30 }
 0x212   : > { %v715_v36 = vsel %vm714_vm3, %v691_v19, %v713_v35  ;;  %v1871_v37 = vpop.xlane.xlu0 %659 }
 0x213   : > { %v717_v38 = vsel %vm716_vm4, %v695_v34, %v715_v36  ;;  %v699_v39 = vrot.slane %v1871_v37, %v1853_v27  ;;  %v1876_v40 = vpop.xlane.xlu1 %662 }
 0x214   : > { %v703_v41 = vrot.slane %v1876_v40, %v1853_v27 }
 0x215   : > { %v719_v42 = vsel %vm718_vm5, %v699_v39, %v717_v38 }
 0x216   : > { %v1881_v43 = vpop.xlane.xlu0 %665  ;;  %v721_v44 = vsel %vm720_vm6, %v703_v41, %v719_v42 }
 0x217   : > { %v707_v45 = vrot.slane %v1881_v43, %v1853_v27  ;;  %v1886_v46 = vpop.xlane.xlu1 %668 }
 0x218   : > { %v711_v47 = vrot.slane %v1886_v46, %v1853_v27 }
 0x219   : > { %v723_v50 = vsel %vm722_vm7, %v707_v45, %v721_v44 }
 0x21a   : > { %v725_v51 = vsel %vm724_vm8, %v711_v47, %v723_v50 }
 0x21b   : > { %727 = vxpose.xlu1.b32.start.end [1/1] (short) (narrow) %v725_v51, 8 }
 0x21e   : > { %v852_v53 = vpop.permute.xlu0 %851 }
 0x21f   : > { %v854_v54 = vadd.f32 %v852_v53, %v843_v52 }
 0x221   : > { %v859_v56 = vrot.slane %v854_v54, %v1828_v31  ;;  %v866_v57 = vrot.slane %v854_v54, %v769_v55  ;;  %v873_v59 = vrot.slane %v854_v54, %v776_v58  ;;  %v880_v0 = vrot.slane %v854_v54, %v783_v63 }
 0x222   : > { %v894_v5 = vrot.slane %v854_v54, %v797_v3  ;;  %v887_v6 = vrot.slane %v854_v54, %v790_v4  ;;  %v901_v13 = vrot.slane %v854_v54, %v804_v10 }
 0x223   : > { %861 = vbcast.lane.b32.xlu0 %v859_v56, 256 }
 0x227   : > { %868 = vbcast.lane.b32.xlu0 %v866_v57, 256 }
 0x22b   : > { %875 = vbcast.lane.b32.xlu0 %v873_v59, 256 }
 0x239   : > { %1316 = vset.pattern.permute.xlu1 %v1533_v16  ;;  %v811_v16 = vsub.s32 7, %v1821_v21 }
 0x23b   : > { %v908_v7 = vrot.slane %v854_v54, %v811_v16 }
 0x295   : > { %v862_v14 = vpop.permute.xlu0 %861 }
 0x299   : > { %v869_v15 = vpop.permute.xlu0 %868 }
 0x29b   : > { %v743_v60 = vpop.trf.xlu1 }
 0x29c   : > { %v777_v61 = vrot.slane %v743_v60, %v776_v58  ;;  %v763_v62 = vrot.slane %v743_v60, %v1828_v31  ;;  %v770_v1 = vrot.slane %v743_v60, %v769_v55  ;;  %v784_v31 = vrot.slane %v743_v60, %v783_v63 }
 0x29d   : > { %v791_v8 = vrot.slane %v743_v60, %v790_v4  ;;  %v798_v9 = vrot.slane %v743_v60, %v797_v3  ;;  %v805_v11 = vrot.slane %v743_v60, %v804_v10  ;;  %v812_v12 = vrot.slane %v743_v60, %v811_v16  ;;  %v876_v17 = vpop.permute.xlu0 %875 }
 0x29e   : > { %779 = vbcast.lane.b32.xlu1 %v777_v61, 256  ;;  %765 = vbcast.lane.b32.xlu0 %v763_v62, 256 }
 0x2a2   : > { %882 = vbcast.lane.b32.xlu1 %v880_v0, 256  ;;  %772 = vbcast.lane.b32.xlu0 %v770_v1, 256 }
 0x2a6   : > { %896 = vbcast.lane.b32.xlu1 %v894_v5, 256  ;;  %889 = vbcast.lane.b32.xlu0 %v887_v6, 256 }
 0x2aa   : > { %910 = vbcast.lane.b32.xlu1 %v908_v7, 256  ;;  %786 = vbcast.lane.b32.xlu0 %v784_v31, 256 }
 0x2ae   : > { %793 = vbcast.lane.b32.xlu0 %v791_v8, 256 }
 0x2b2   : > { %800 = vbcast.lane.b32.xlu0 %v798_v9, 256 }
 0x2b6   : > { %807 = vbcast.lane.b32.xlu0 %v805_v11, 256 }
 0x2ba   : > { %814 = vbcast.lane.b32.xlu0 %v812_v12, 256 }
 0x2be   : > { %903 = vbcast.lane.b32.xlu0 %v901_v13, 256 }
 0x310   : > { %v766_v18 = vpop.permute.xlu0 %765  ;;  %v780_v22 = vpop.permute.xlu1 %779 }
 0x311   : > { %v824_v20 = vadd.f32 %v766_v18, %v1850_v26  ;;  %v826_v25 = vadd.f32 %v780_v22, %v1855_v28 }
 0x313   : > { %v832_v23 = vmul.f32 0.5, %v824_v20  ;;  %v834_v34 = vmul.f32 0.5, %v826_v25 }
 0x314   : > { %v773_v24 = vpop.permute.xlu0 %772  ;;  %v883_v28 = vpop.permute.xlu1 %882 }
 0x315   : > { %v920_v30 = vadd.f32 %v862_v14, %v832_v23  ;;  %v825_v21 = vadd.f32 %v773_v24, %v1857_v29  ;;  %v922_v26 = vadd.f32 %v876_v17, %v834_v34 }
 0x317   : > { %v833_v32 = vmul.f32 0.5, %v825_v21  ;;  %vm928_vm9 = vcmp.gt.f32.partialorder %v920_v30, 0.0  ;;  %vm930_vm11 = vcmp.gt.f32.partialorder %v922_v26, 0.0 }
 0x318   : > { %v890_v19 = vpop.permute.xlu0 %889  ;;  %v1174_v36 = vsel %vm928_vm9, 1.0, %v1532_v2  ;;  %v1176_v49 = vsel %vm930_vm11, 1.0, %v1532_v2  ;;  %v897_v55 = vpop.permute.xlu1 %896 }
 0x319   : > { %v921_v35 = vadd.f32 %v869_v15, %v833_v32 }
 0x31b   : > { %vm929_vm10 = vcmp.gt.f32.partialorder %v921_v35, 0.0 }
 0x31c   : > { %v1175_v38 = vsel %vm929_vm10, 1.0, %v1532_v2  ;;  %v787_v39 = vpop.permute.xlu0 %786  ;;  %v911_v0 = vpop.permute.xlu1 %910 }
 0x31d   : > { %v827_v41 = vadd.f32 %v787_v39, %v1863_v33  ;;  %v1311_v42 = vpack.i.bf16 %v1175_v38, %v1174_v36 }
 0x31f   : > { %v835_v44 = vmul.f32 0.5, %v827_v41  ;;  %1312 = vperm.xlu0 %1310, %v1311_v42  }
 0x320   : > { %v794_v45 = vpop.permute.xlu0 %793 }
 0x321   : > { %v923_v29 = vadd.f32 %v883_v28, %v835_v44  ;;  %v828_v47 = vadd.f32 %v794_v45, %v1871_v37 }
 0x323   : > { %vm931_vm12 = vcmp.gt.f32.partialorder %v923_v29, 0.0  ;;  %v836_v48 = vmul.f32 0.5, %v828_v47 }
 0x324   : > { %v1177_v50 = vsel %vm931_vm12, 1.0, %v1532_v2  ;;  %v801_v51 = vpop.permute.xlu0 %800 }
 0x325   : > { %v924_v52 = vadd.f32 %v890_v19, %v836_v48  ;;  %v829_v53 = vadd.f32 %v801_v51, %v1876_v40  ;;  %v1317_v33 = vpack.i.bf16 %v1177_v50, %v1176_v49 }
 0x327   : > { %v837_v54 = vmul.f32 0.5, %v829_v53  ;;  %1318 = vperm.xlu1 %1316, %v1317_v33   ;;  %vm932_vm13 = vcmp.gt.f32.partialorder %v924_v52, 0.0 }
 0x328   : > { %v808_v56 = vpop.permute.xlu0 %807  ;;  %v1178_v58 = vsel %vm932_vm13, 1.0, %v1532_v2 }
 0x329   : > { %v925_v57 = vadd.f32 %v897_v55, %v837_v54  ;;  %v830_v37 = vadd.f32 %v808_v56, %v1881_v43 }
 0x32b   : > { %vm933_vm14 = vcmp.gt.f32.partialorder %v925_v57, 0.0  ;;  %v838_v63 = vmul.f32 0.5, %v830_v37 }
 0x32c   : > { %v1179_v59 = vsel %vm933_vm14, 1.0, %v1532_v2  ;;  %v815_v60 = vpop.permute.xlu0 %814 }
 0x32d   : > { %v831_v61 = vadd.f32 %v815_v60, %v1886_v46  ;;  %v1322_v62 = vpack.i.bf16 %v1179_v59, %v1178_v58 }
 0x32f   : > { %v839_v40 = vmul.f32 0.5, %v831_v61  ;;  %1323 = vperm.xlu0 %1310, %v1322_v62  }
 0x330   : > { %v904_v1 = vpop.permute.xlu0 %903 }
 0x331   : > { %v927_v3 = vadd.f32 %v911_v0, %v839_v40  ;;  %v926_v4 = vadd.f32 %v904_v1, %v838_v63 }
 0x333   : > { %vm935_vm15 = vcmp.gt.f32.partialorder %v927_v3, 0.0  ;;  %vm934_vm0 = vcmp.gt.f32.partialorder %v926_v4, 0.0 }
 0x334   : > { %v1181_v5 = vsel %vm935_vm15, 1.0, %v1532_v2  ;;  %v1180_v43 = vsel %vm934_vm0, 1.0, %v1532_v2 }
 0x335   : > { %v1327_v6 = vpack.i.bf16 %v1181_v5, %v1180_v43 }
 0x337   : > { %1328 = vperm.xlu1 %1316, %v1327_v6  }
 0x39e   : > { %v1313_v16 = vpop.permute.xlu0 %1312 }
 0x39f   : > { %v1315_v31 = vunpack.i.h.bf16 %v1313_v16  ;;  %v1314_v46 = vunpack.i.l.bf16 %v1313_v16 }
 0x3a1   : > { %v991_v9 = vrot.slane %v1315_v31, %v1853_v27  ;;  %v987_v10 = vrot.slane %v1314_v46, %v1853_v27 }
 0x3a3   : > { %v1016_v2 = vsel %vm712_vm2, %v991_v9, %v987_v10 }
 0x3a6   : > { %v1319_v7 = vpop.permute.xlu1 %1318 }
 0x3a7   : > { %v1320_v8 = vunpack.i.l.bf16 %v1319_v7  ;;  %v1321_v11 = vunpack.i.h.bf16 %v1319_v7 }
 0x3a9   : > { %v995_v13 = vrot.slane %v1320_v8, %v1853_v27  ;;  %v999_v15 = vrot.slane %v1321_v11, %v1853_v27 }
 0x3ab   : > { %v1017_v18 = vsel %vm714_vm3, %v995_v13, %v1016_v2 }
 0x3ac   : > { %v1018_v22 = vsel %vm716_vm4, %v999_v15, %v1017_v18 }
 0x3ae   : > { %v1324_v12 = vpop.permute.xlu0 %1323 }
 0x3af   : > { %v1325_v14 = vunpack.i.l.bf16 %v1324_v12  ;;  %v1326_v17 = vunpack.i.h.bf16 %v1324_v12 }
 0x3b1   : > { %v1003_v20 = vrot.slane %v1325_v14, %v1853_v27  ;;  %v1007_v23 = vrot.slane %v1326_v17, %v1853_v27 }
 0x3b3   : > { %v1019_v25 = vsel %vm718_vm5, %v1003_v20, %v1018_v22 }
 0x3b4   : > { %v1020_v34 = vsel %vm720_vm6, %v1007_v23, %v1019_v25 }
 0x3b6   : > { %v1329_v24 = vpop.permute.xlu1 %1328 }
 0x3b7   : > { %v1331_v30 = vunpack.i.h.bf16 %v1329_v24  ;;  %v1330_v21 = vunpack.i.l.bf16 %v1329_v24 }
 0x3b9   : > { %v1015_v32 = vrot.slane %v1331_v30, %v1853_v27  ;;  %v1011_v19 = vrot.slane %v1330_v21, %v1853_v27 }
 0x3bb   : > { %v1021_v35 = vsel %vm722_vm7, %v1011_v19, %v1020_v34 }
 0x3bc   : > { %v1022_v36 = vsel %vm724_vm8, %v1015_v32, %v1021_v35 }
 0x3bd   : > { %1025 = vst.msk [vmem:[%s364_s15] sm:$0xff] %vm1024_vm1, %v1022_v36 }
 0x3be   : > { %1461 = shalt.err (!%p1458_p4)
}
 0x3bf   : > { %s1462_s30 = scalar_lea.hbm %s1940_s23, 128  ;;  %s1466_s25 = scalar_lea.hbm %s1991_s7, 384 }
 0x3c0   : > { %p1463_p8 = scmp.ne.s32.totalorder %s1940_s23, %s1462_s30  ;;  %p1467_p2 = scmp.lt.u32.totalorder %s1940_s23, %s1991_s7 }
 0x3c1   : > { %p1468_p10 = scmp.lt.u32.totalorder %s1466_s25, %s1462_s30  ;;  %p1470_p3 = scmp.lt.u32.totalorder %s1462_s30, %s1940_s23 }
 0x3c2   : > { %p1464_p11 = pnand %p1463_p8, %p1697_p6 }
 0x3c3   : > { %p1469_p13 = por %p1468_p10, %p1467_p2 }
 0x3c4   : > { %p1465_p0 = pneg %p1464_p11 }
 0x3c5   : > { %p1471_p7 = por %p1470_p3, %p1469_p13 }
 0x3c7   : > { %p1472_p9 = pnand %p1471_p7, %p1465_p0 }
 0x3c9   : > { %1475 = shalt.err (!%p1472_p9)
}
 0x3ca   : > { %1243 = dma.vmem_to_hbm [thread:$0]  (%p1697_p6), %s1942_s21, 128, %s1940_s23, %s1027_s5  }
 0x3cb PF: > { %p1268_p12 = scmp.ge.s32.totalorder %s1522_s29, 2  ;;  %s1052_s19 = sand.u32 1, %s1510_s26  }
 0x3cc   : > { %p2012_p5 = scmp.ne.s32.totalorder %s1999_s9, 0  ;;  %s1053_s15 = scalar_lea.sflag [#allocation5], %s1052_s19 }
 0x3ce   : > { %p1260_p1 = pnand %p1268_p12, %p2012_p5 }
 0x3d0   : > { %1505 = dma.done.wait (!%p1260_p1), %s1053_s15, 128  }
 0x3d1   : > { %1507 = vsyncadd (!%p1260_p1), %s1053_s15, 4294967168  ;;  %p26_p4 = scmp.ge.s32.totalorder %s1687_s13, 5   ;;  %s2013_s26 = smov %s1514_s27 }
 0x3d2   : > { %s2014_s27 = smov %s1518_s28  ;;  %s2015_s28 = smov %s1703_s16 }
 0x3d3   : > { %s2016_s29 = smov %s1687_s13  ;;  %28 = sbr.rel (!%p26_p4) target bundleno = 11 (0xb), region = 115 }
 0x3da   :  { %1058 = vsyncpa [#allocation4], 1 }
 0x3db   :  { %1060 = vsyncpa [#allocation4 + $0x1], 1 }
 0x3dc   :  { %1061 = vsyncpa [#allocation7], 1 }
 0x3dd   :  { %1062 = vsyncpa [#allocation10], 1 }
 0x3de   :  { %1064 = vsyncpa [#allocation10 + $0x1], 1 }
 0x3df   :  { %1065 = vsyncpa [#allocation5], 1 }
 0x3e0   :  { %1067 = vsyncpa [#allocation5 + $0x1], 1 }

</bundles_post_ra>
